<compile_context>
chip_gen: v7x
topology: tpu7x:2x2x1
jax: 0.10.0
libtpu: 0.0.40
codegen_flags: <defaults>
</compile_context>

<pallas_src>
import math
import jax
import jax.numpy as jnp
from jax.experimental import pallas as pl
from jax.experimental.pallas import tpu as pltpu


# ----------------------------------------------------------------------------
# Packed-parameter layout: each fused weight lives in its own full-width
# (rows, 128) block (rows multiple of 8); biases are replicated to 8 sublanes.
# All padding is zeros, which makes full-width dots exactly correct.
# ----------------------------------------------------------------------------
def _param_layout(D, L, O):
    def rpad(n):
        return max(8, ((n + 7) // 8) * 8)

    K = 128  # full-width contraction for weights consumed by full-width activations
    specs = [
        ("w1",   K),        # rows[0:D)   : fused conv_input weight  [W[:,:,1] | W[:,:,0]]
        ("w2",   K),        # rows[0:4D)  : conv_hidden block weight
        ("wh",   K),        # rows[0:12D) : fused fc_mean | fc_log_var heads
        ("wfh",  rpad(L)),  # rows[0:L)   : fc_hidden
        ("wd12", K),        # rows[0:4O)  : fused deconv_hidden @ deconv_output (both k=1)
        ("wfo",  K),        # rows[0:O)   : fc_output
        ("b1", 8), ("b2", 8), ("bh", 8), ("bfh", 8), ("b12", 8), ("bfo", 8),
    ]
    layout, row = {}, 0
    for name, r in specs:
        layout[name] = (row, r)
        row += r
    return layout, row, 128


def make_kernel(D, L, O, B, layout):
    f32 = jnp.float32

    def w(p_ref, name):
        row, r = layout[name]
        return p_ref[row:row + r, :]           # aligned full-width (r,128) block

    def bias(p_ref, name):
        row, _ = layout[name]
        if B == 8:                              # plain vreg add, no sublane broadcast
            return p_ref[row:row + 8, :]
        return p_ref[row:row + 1, :]            # broadcast fallback for other batch sizes

    def dot(a, b):
        return jnp.dot(a, b, preferred_element_type=f32)

    def vae_conv_kernel(xe_ref, p_ref, out_ref):
        xe = xe_ref[...]                        # (B,128): x in lanes [0:D), eps in [D:D+L)
        eps = xe[:, D:D + L]                    # (B, L)

        # ---- Encoder (3 MXU dots, all full-width) ----
        # conv_input (k=2, pad=1, length-1 seq): both output timesteps in one matmul.
        h1 = jnp.maximum(dot(xe, w(p_ref, "w1")) + bias(p_ref, "b1"), 0.0)
        # conv_hidden (k=2, pad=1, length-2 seq): all three timesteps in one block matmul.
        h2 = jnp.tanh(dot(h1, w(p_ref, "w2")) + bias(p_ref, "b2"))
        # fc_mean and fc_log_var fused into one head matmul.
        heads = dot(h2, w(p_ref, "wh")) + bias(p_ref, "bh")
        mean = heads[:, 0:L]
        log_var = heads[:, L:2 * L]
        std = jnp.exp(0.5 * log_var)            # PyTorch reference calls this `var`
        z = mean + eps * std                    # reparameterization trick

        # ---- Decoder ----
        bfh = bias(p_ref, "bfh")
        if L == 1:
            # K=1 matmul replaced by a VPU broadcast multiply (drops one MXU pass).
            wfh_row0 = layout["wfh"][0]
            h = jnp.maximum(z * p_ref[wfh_row0:wfh_row0 + 1, :] + bfh, 0.0)
        else:
            wfh_row0 = layout["wfh"][0]
            h = jnp.maximum(dot(z, p_ref[wfh_row0:wfh_row0 + L, :]) + bfh, 0.0)
        hd = dot(h, w(p_ref, "wd12")) + bias(p_ref, "b12")        # fused k=1 deconvs
        out = dot(jnp.tanh(hd), w(p_ref, "wfo")) + bias(p_ref, "bfo")

        # ---- Single lane-dense (B,128) store: [out | z | mean | std | log_var | 0...] ----
        pad = 128 - (O + 4 * L)
        out_ref[...] = jnp.concatenate(
            [out[:, :O], z, mean, std, log_var, jnp.zeros((B, pad), f32)], axis=-1)

    return vae_conv_kernel


# ----------------------------------------------------------------------------
# Parameter init (PyTorch-default-style uniform bounds) and host-side packing.
# ----------------------------------------------------------------------------
def _uniform(key, shape, bound):
    return jax.random.uniform(key, shape, jnp.float32, -bound, bound)


def init_params(key, input_dim=4, latent_dim=1, output_dim=4):
    D, L, O = input_dim, latent_dim, output_dim
    ks = jax.random.split(key, 16)
    p = {}
    b = 1.0 / math.sqrt(D * 2)
    p["conv_in_w"] = _uniform(ks[0], (2 * D, D, 2), b)          # (out_ch, in_ch, k)
    p["conv_in_b"] = _uniform(ks[1], (2 * D,), b)
    b = 1.0 / math.sqrt(2 * D * 2)
    p["conv_hid_w"] = _uniform(ks[2], (4 * D, 2 * D, 2), b)
    p["conv_hid_b"] = _uniform(ks[3], (4 * D,), b)
    b = 1.0 / math.sqrt(4 * D * 3)
    p["fc_mean_w"] = _uniform(ks[4], (L, 4 * D * 3), b)         # (out, in)
    p["fc_mean_b"] = _uniform(ks[5], (L,), b)
    p["fc_logvar_w"] = _uniform(ks[6], (L, 4 * D * 3), b)
    p["fc_logvar_b"] = _uniform(ks[7], (L,), b)
    b = 1.0 / math.sqrt(L)
    p["fc_hidden_w"] = _uniform(ks[8], (4 * O, L), b)
    p["fc_hidden_b"] = _uniform(ks[9], (4 * O,), b)
    b = 1.0 / math.sqrt(4 * O)
    p["deconv_hid_w"] = _uniform(ks[10], (4 * O, 2 * O, 1), b)  # (in_ch, out_ch, k)
    p["deconv_hid_b"] = _uniform(ks[11], (2 * O,), b)
    b = 1.0 / math.sqrt(2 * O)
    p["deconv_out_w"] = _uniform(ks[12], (2 * O, O, 1), b)
    p["deconv_out_b"] = _uniform(ks[13], (O,), b)
    b = 1.0 / math.sqrt(O)
    p["fc_out_w"] = _uniform(ks[14], (O, O), b)
    p["fc_out_b"] = _uniform(ks[15], (O,), b)
    return p


def pack_params(p, input_dim=4, latent_dim=1, output_dim=4):
    """All weight fusions, transposes, zero-padding and bias replication happen ONCE here."""
    D, L, O = input_dim, latent_dim, output_dim
    layout, rows, cols = _param_layout(D, L, O)

    # conv_input: t0 uses W[:,:,1], t1 uses W[:,:,0]  -> (D, 4D)
    w1k0 = p["conv_in_w"][:, :, 0].T
    w1k1 = p["conv_in_w"][:, :, 1].T
    w1 = jnp.concatenate([w1k1, w1k0], axis=1)
    b1 = jnp.tile(p["conv_in_b"], 2)

    # conv_hidden block weight: (4D, 12D)
    w2k0 = p["conv_hid_w"][:, :, 0].T
    w2k1 = p["conv_hid_w"][:, :, 1].T
    zero = jnp.zeros_like(w2k0)
    w2 = jnp.concatenate([
        jnp.concatenate([w2k1, w2k0, zero], axis=1),
        jnp.concatenate([zero, w2k1, w2k0], axis=1),
    ], axis=0)
    b2 = jnp.tile(p["conv_hid_b"], 3)

    # fc_mean / fc_log_var: channel-major flatten index is c*3 + t  -> (12D, 2L)
    def split_t(wm):  # (L, 12D) -> (12D, L) laid out [t0-rows; t1-rows; t2-rows]
        return jnp.concatenate([wm[:, 0::3].T, wm[:, 1::3].T, wm[:, 2::3].T], axis=0)
    wh = jnp.concatenate([split_t(p["fc_mean_w"]), split_t(p["fc_logvar_w"])], axis=1)
    bh = jnp.concatenate([p["fc_mean_b"], p["fc_logvar_b"]])

    wfh = p["fc_hidden_w"].T                  # (L, 4O)
    bfh = p["fc_hidden_b"]

    # Two back-to-back kernel_size=1 ConvTranspose1d layers collapse exactly.
    wd1 = p["deconv_hid_w"][:, :, 0]          # (4O, 2O)
    wd2 = p["deconv_out_w"][:, :, 0]          # (2O, O)
    wd12 = wd1 @ wd2
    b12 = p["deconv_hid_b"] @ wd2 + p["deconv_out_b"]

    wfo = p["fc_out_w"].T
    bfo = p["fc_out_b"]

    weights = {"w1": w1, "w2": w2, "wh": wh, "wfh": wfh, "wd12": wd12, "wfo": wfo}
    biases = {"b1": b1, "b2": b2, "bh": bh, "bfh": bfh, "b12": b12, "bfo": bfo}

    packed = jnp.zeros((rows, cols), jnp.float32)
    for name, m in weights.items():
        row, r = layout[name]
        rr, cc = m.shape
        assert rr <= r and cc <= cols, (name, m.shape)
        packed = packed.at[row:row + rr, :cc].set(m.astype(jnp.float32))
    for name, b in biases.items():
        row, r = layout[name]
        cc = b.shape[0]
        assert cc <= cols, (name, b.shape)
        # Replicate to 8 sublanes so the in-kernel bias add is a plain vreg add.
        packed = packed.at[row:row + 8, :cc].set(
            jnp.tile(b[None, :].astype(jnp.float32), (8, 1)))
    return packed


# ----------------------------------------------------------------------------
# Forward: one pallas_call, 2 inputs (lane-packed x|eps, packed params),
# 1 lane-dense (B,128) packed output.
# ----------------------------------------------------------------------------
def vae_conv_forward(x, eps, packed_params, input_dim=4, latent_dim=1, output_dim=4):
    D, L, O = input_dim, latent_dim, output_dim
    B = x.shape[0]
    assert D + L <= 128 and O + 4 * L <= 128, "dims exceed single-vreg lane packing"
    layout, rows, cols = _param_layout(D, L, O)
    kernel = make_kernel(D, L, O, B, layout)
    vmem = pl.BlockSpec(memory_space=pltpu.MemorySpace.VMEM)

    # Lane-pack x and eps into one full-width (B, 128) f32 operand (2 input DMAs total).
    xe = jnp.concatenate(
        [x.astype(jnp.float32), eps.astype(jnp.float32),
         jnp.zeros((B, 128 - D - L), jnp.float32)], axis=-1)

    cost = pl.CostEstimate(
        flops=2 * B * 128 * 128 * 5,
        transcendentals=B * (12 * D + O + L),
        bytes_accessed=4 * (B * 128 + rows * cols + B * 128),
    )

    packed_out = pl.pallas_call(
        kernel,
        out_shape=jax.ShapeDtypeStruct((B, 128), jnp.float32),
        in_specs=[vmem, vmem],
        out_specs=vmem,
        cost_estimate=cost,
    )(xe, packed_params)

    out = packed_out[:, :O]
    z = packed_out[:, O:O + L]
    mean = packed_out[:, O + L:O + 2 * L]
    var = packed_out[:, O + 2 * L:O + 3 * L]      # = exp(0.5*log_var): std, named `var` per PyTorch ref
    log_var = packed_out[:, O + 3 * L:O + 4 * L]
    return out, z, mean, var, log_var


# Pure-JAX unfused reference (mirrors the PyTorch module exactly) — sanity check only.
def vae_conv_reference(x, eps, p):
    W1, b1 = p["conv_in_w"], p["conv_in_b"]
    h_t0 = jnp.maximum(x @ W1[:, :, 1].T + b1, 0.0)
    h_t1 = jnp.maximum(x @ W1[:, :, 0].T + b1, 0.0)
    W2, b2 = p["conv_hid_w"], p["conv_hid_b"]
    g_t0 = jnp.tanh(h_t0 @ W2[:, :, 1].T + b2)
    g_t1 = jnp.tanh(h_t0 @ W2[:, :, 0].T + h_t1 @ W2[:, :, 1].T + b2)
    g_t2 = jnp.tanh(h_t1 @ W2[:, :, 0].T + b2)
    h = jnp.stack([g_t0, g_t1, g_t2], axis=2).reshape(x.shape[0], -1)  # channel-major flatten
    mean = h @ p["fc_mean_w"].T + p["fc_mean_b"]
    log_var = h @ p["fc_logvar_w"].T + p["fc_logvar_b"]
    var = jnp.exp(0.5 * log_var)
    z = mean + eps * var
    hd = jnp.maximum(z @ p["fc_hidden_w"].T + p["fc_hidden_b"], 0.0)
    hd = hd @ p["deconv_hid_w"][:, :, 0] + p["deconv_hid_b"]
    o = hd @ p["deconv_out_w"][:, :, 0] + p["deconv_out_b"]
    out = jnp.tanh(o) @ p["fc_out_w"].T + p["fc_out_b"]
    return out, z, mean, var, log_var


if __name__ == "__main__":
    INPUT_DIM, LATENT_DIM, OUTPUT_DIM, BATCH = 4, 1, 4, 8

    key = jax.random.PRNGKey(0)
    k_params, k_x, k_eps = jax.random.split(key, 3)

    params = init_params(k_params, INPUT_DIM, LATENT_DIM, OUTPUT_DIM)
    x = jax.random.normal(k_x, (BATCH, INPUT_DIM), jnp.float32)
    # torch.randn_like noise for the reparameterization trick, supplied explicitly
    eps = jax.random.normal(k_eps, (BATCH, LATENT_DIM), jnp.float32)

    # Weight fusion/packing happens once, outside the per-call path.
    packed = pack_params(params, INPUT_DIM, LATENT_DIM, OUTPUT_DIM)

    fwd = jax.jit(lambda xx, ee, pp: vae_conv_forward(
        xx, ee, pp, INPUT_DIM, LATENT_DIM, OUTPUT_DIM))

    outs = fwd(x, eps, packed)
    jax.block_until_ready(outs)
    output, z, mean, var, log_var = outs

    assert output.shape == (BATCH, OUTPUT_DIM)
    assert z.shape == mean.shape == var.shape == log_var.shape == (BATCH, LATENT_DIM)

    # Validate the fused kernel against the unfused reference.
    refs = vae_conv_reference(x, eps, params)
    for got, want in zip(outs, refs):
        assert jnp.allclose(got, want, rtol=1e-3, atol=1e-3)

    print("KERNEL_OK")
</pallas_src>

<mosaic_0001>
module attributes {stable_mosaic.version = 11 : i64} {
  func.func @vae_conv_kernel(%arg0: memref<8x128xf32, #tpu.memory_space<vmem>>, %arg1: memref<696x128xf32, #tpu.memory_space<vmem>>, %arg2: memref<8x128xf32, #tpu.memory_space<vmem>>) attributes {dimension_semantics = [], scalar_prefetch = 0 : i64, scratch_operands = 0 : i64, tpu.core_type = #tpu.core_type<tc>} {
    %c0 = arith.constant 0 : index
    %c0_0 = arith.constant 0 : index
    %0 = vector.load %arg0[%c0, %c0_0] : memref<8x128xf32, #tpu.memory_space<vmem>>, vector<8x128xf32>
    %1 = vector.extract_strided_slice %0 {offsets = [0, 4], sizes = [8, 1], strides = [1, 1]} : vector<8x128xf32> to vector<8x1xf32>
    %c0_1 = arith.constant 0 : index
    %c0_2 = arith.constant 0 : index
    %2 = vector.load %arg1[%c0_1, %c0_2] : memref<696x128xf32, #tpu.memory_space<vmem>>, vector<128x128xf32>
    %cst = arith.constant dense<0.000000e+00> : vector<8x128xf32>
    %3 = tpu.matmul %0, %2, %cst {dimension_numbers = #tpu.dot_dimension_numbers<[1], [0], [0], [1], [0, 0, 1, 1], [], []>} : vector<8x128xf32>, vector<128x128xf32>, vector<8x128xf32> -> vector<8x128xf32>
    %c648 = arith.constant 648 : index
    %c0_3 = arith.constant 0 : index
    %4 = vector.load %arg1[%c648, %c0_3] : memref<696x128xf32, #tpu.memory_space<vmem>>, vector<8x128xf32>
    %5 = arith.addf %3, %4 : vector<8x128xf32>
    %cst_4 = arith.constant 0.000000e+00 : f32
    %6 = vector.broadcast %cst_4 : f32 to vector<8x128xf32>
    %7 = arith.maximumf %5, %6 : vector<8x128xf32>
    %c128 = arith.constant 128 : index
    %c0_5 = arith.constant 0 : index
    %8 = vector.load %arg1[%c128, %c0_5] : memref<696x128xf32, #tpu.memory_space<vmem>>, vector<128x128xf32>
    %cst_6 = arith.constant dense<0.000000e+00> : vector<8x128xf32>
    %9 = tpu.matmul %7, %8, %cst_6 {dimension_numbers = #tpu.dot_dimension_numbers<[1], [0], [0], [1], [0, 0, 1, 1], [], []>} : vector<8x128xf32>, vector<128x128xf32>, vector<8x128xf32> -> vector<8x128xf32>
    %c656 = arith.constant 656 : index
    %c0_7 = arith.constant 0 : index
    %10 = vector.load %arg1[%c656, %c0_7] : memref<696x128xf32, #tpu.memory_space<vmem>>, vector<8x128xf32>
    %11 = arith.addf %9, %10 : vector<8x128xf32>
    %12 = math.tanh %11 : vector<8x128xf32>
    %c256 = arith.constant 256 : index
    %c0_8 = arith.constant 0 : index
    %13 = vector.load %arg1[%c256, %c0_8] : memref<696x128xf32, #tpu.memory_space<vmem>>, vector<128x128xf32>
    %cst_9 = arith.constant dense<0.000000e+00> : vector<8x128xf32>
    %14 = tpu.matmul %12, %13, %cst_9 {dimension_numbers = #tpu.dot_dimension_numbers<[1], [0], [0], [1], [0, 0, 1, 1], [], []>} : vector<8x128xf32>, vector<128x128xf32>, vector<8x128xf32> -> vector<8x128xf32>
    %c664 = arith.constant 664 : index
    %c0_10 = arith.constant 0 : index
    %15 = vector.load %arg1[%c664, %c0_10] : memref<696x128xf32, #tpu.memory_space<vmem>>, vector<8x128xf32>
    %16 = arith.addf %14, %15 : vector<8x128xf32>
    %17 = vector.extract_strided_slice %16 {offsets = [0, 0], sizes = [8, 1], strides = [1, 1]} : vector<8x128xf32> to vector<8x1xf32>
    %18 = vector.extract_strided_slice %16 {offsets = [0, 1], sizes = [8, 1], strides = [1, 1]} : vector<8x128xf32> to vector<8x1xf32>
    %cst_11 = arith.constant 5.000000e-01 : f32
    %19 = vector.broadcast %cst_11 : f32 to vector<8x1xf32>
    %20 = arith.mulf %19, %18 : vector<8x1xf32>
    %21 = math.exp %20 : vector<8x1xf32>
    %22 = arith.mulf %1, %21 : vector<8x1xf32>
    %23 = arith.addf %17, %22 : vector<8x1xf32>
    %c672 = arith.constant 672 : index
    %c0_12 = arith.constant 0 : index
    %24 = vector.load %arg1[%c672, %c0_12] : memref<696x128xf32, #tpu.memory_space<vmem>>, vector<8x128xf32>
    %c384 = arith.constant 384 : index
    %c0_13 = arith.constant 0 : index
    %25 = vector.load %arg1[%c384, %c0_13] : memref<696x128xf32, #tpu.memory_space<vmem>>, vector<1x128xf32>
    %26 = vector.broadcast %23 : vector<8x1xf32> to vector<8x128xf32>
    %27 = vector.broadcast %25 : vector<1x128xf32> to vector<8x128xf32>
    %28 = arith.mulf %26, %27 : vector<8x128xf32>
    %29 = arith.addf %28, %24 : vector<8x128xf32>
    %cst_14 = arith.constant 0.000000e+00 : f32
    %30 = vector.broadcast %cst_14 : f32 to vector<8x128xf32>
    %31 = arith.maximumf %29, %30 : vector<8x128xf32>
    %c392 = arith.constant 392 : index
    %c0_15 = arith.constant 0 : index
    %32 = vector.load %arg1[%c392, %c0_15] : memref<696x128xf32, #tpu.memory_space<vmem>>, vector<128x128xf32>
    %cst_16 = arith.constant dense<0.000000e+00> : vector<8x128xf32>
    %33 = tpu.matmul %31, %32, %cst_16 {dimension_numbers = #tpu.dot_dimension_numbers<[1], [0], [0], [1], [0, 0, 1, 1], [], []>} : vector<8x128xf32>, vector<128x128xf32>, vector<8x128xf32> -> vector<8x128xf32>
    %c680 = arith.constant 680 : index
    %c0_17 = arith.constant 0 : index
    %34 = vector.load %arg1[%c680, %c0_17] : memref<696x128xf32, #tpu.memory_space<vmem>>, vector<8x128xf32>
    %35 = arith.addf %33, %34 : vector<8x128xf32>
    %36 = math.tanh %35 : vector<8x128xf32>
    %c520 = arith.constant 520 : index
    %c0_18 = arith.constant 0 : index
    %37 = vector.load %arg1[%c520, %c0_18] : memref<696x128xf32, #tpu.memory_space<vmem>>, vector<128x128xf32>
    %cst_19 = arith.constant dense<0.000000e+00> : vector<8x128xf32>
    %38 = tpu.matmul %36, %37, %cst_19 {dimension_numbers = #tpu.dot_dimension_numbers<[1], [0], [0], [1], [0, 0, 1, 1], [], []>} : vector<8x128xf32>, vector<128x128xf32>, vector<8x128xf32> -> vector<8x128xf32>
    %c688 = arith.constant 688 : index
    %c0_20 = arith.constant 0 : index
    %39 = vector.load %arg1[%c688, %c0_20] : memref<696x128xf32, #tpu.memory_space<vmem>>, vector<8x128xf32>
    %40 = arith.addf %38, %39 : vector<8x128xf32>
    %41 = vector.extract_strided_slice %40 {offsets = [0, 0], sizes = [8, 4], strides = [1, 1]} : vector<8x128xf32> to vector<8x4xf32>
    %cst_21 = arith.constant 0.000000e+00 : f32
    %42 = vector.broadcast %cst_21 : f32 to vector<8x120xf32>
    %43 = tpu.concatenate %41, %23, %17, %21, %18, %42 in 1 : vector<8x4xf32>, vector<8x1xf32>, vector<8x1xf32>, vector<8x1xf32>, vector<8x1xf32>, vector<8x120xf32> -> vector<8x128xf32>
    %c0_22 = arith.constant 0 : index
    %c0_23 = arith.constant 0 : index
    %44 = vector.load %arg2[%c0_22, %c0_23] : memref<8x128xf32, #tpu.memory_space<vmem>>, vector<8x128xf32>
    tpu.vector_store %arg2[%c0_22, %c0_23], %43 {strides = array<i32>} : memref<8x128xf32, #tpu.memory_space<vmem>>, vector<8x128xf32>,
    return
  }
}

</mosaic_0001>

<bundles_post_ra>
// kernel: _lambda_.1
= control target key start
LH: loop header
LB: loop body
LE: loop exit
PB: predicated region body
PF: predicated region fallthrough
CT: control target
= control target key end

     0   :  { %7 = vsyncpa [#allocation3], 0  ;;  %s945_s9 = smov [#allocation2]   ;;  %s1046_s0 = inlined_call_operand.vmem [shape: f32[8,128], index: 0, kind: input, shape index: {}]   ;;  %s1047_s1 = inlined_call_operand.hbm [shape: f32[696,128], index: 1, kind: input, shape index: {}]   ;;  %s1048_s2 = inlined_call_operand.vmem [shape: f32[8,128], index: 2, kind: output, shape index: {}]  }
   0x1   :  { %s15_s10 = sshll.u32 %s945_s9, 4  ;;  %s921_s13 = scalar_lea.hbm %s1047_s1, 11136  ;;  %s16_s10 = int_to_ptr.vmem [resolvable:$true] %s15_s10 }
   0x2   :  { %p922_p0 = scmp.ne.s32.totalorder %s1047_s1, %s921_s13  ;;  %p925_p1 = scmp.lt.u32.totalorder %s921_s13, %s1047_s1 }
   0x4   :  { %p927_p2 = pnand %p925_p1, %p922_p0 }
   0x6   :  { %930 = shalt.err (!%p927_p2)
}
   0x7   :  { %s931_s18 = scalar_lea.vmem %s16_s10, 11136  ;;  %p936_p4 = scmp.lt.s32.totalorder %s16_s10, %s16_s10 }
   0x8   :  { %p932_p3 = scmp.ne.s32.totalorder %s16_s10, %s931_s18  ;;  %p937_p5 = scmp.lt.s32.totalorder %s931_s18, %s931_s18 }
   0xa   :  { %p938_p6 = por %p937_p5, %p936_p4 }
   0xc   :  { %p939_p7 = pnand %p938_p6, %p932_p3 }
   0xe   :  { %942 = shalt.err (!%p939_p7)
}
   0xf   :  { %s946_s19 = smov 128   ;;  %s947_s20 = smov 8  }
  0x10   :  { %21 = dma.hbm_to_vmem [thread:$0]  %s1047_s1, 11136, %s16_s10, [#allocation3], %s946_s19, %s946_s19, %s947_s20  }
  0x11   :  { %943 = dma.done.wait [#allocation3], 11136  }
  0x12   :  { %944 = vsyncadd [#allocation3], 4294956160  ;;  %v948_v0 = vmov 0.0|0.0   ;;  %vm949_vm0 = vmmov 0   ;;  %v950_v1 = vmov 0.0   ;;  %v26_v2 = vld [vmem:[#allocation2] sm:$0xff] }
  0x13   :  { %781 = vmatprep.subr.bf16.mxu0 %v948_v0  ;;  %638 = vmatprep.mubr.msk.f32.mxu0 %vm949_vm0, %v950_v1  ;;  %v27_v3 = vld [vmem:[#allocation2 + $0x8] sm:$0xff]  ;;  %v28_v4 = vld [vmem:[#allocation2 + $0x10] sm:$0xff]  ;;  %v29_v6 = vld [vmem:[#allocation2 + $0x18] sm:$0xff]  ;;  %s953_s24 = smov 124   ;;  %s954_s25 = smov 5   ;;  %vm504_vm1 = vcmask 31744  }
  0x14   :  { %805 = vmatprep.subr.bf16.mxu1 %v948_v0  ;;  %673 = vmatprep.mubr.msk.f32.mxu1 %vm949_vm0, %v950_v1  ;;  %v782_v5 = vpack.c.bf16 %v27_v3, %v26_v2  ;;  %v785_v7 = vpack.c.bf16 %v29_v6, %v28_v4  ;;  %v30_v8 = vld [vmem:[#allocation2 + $0x20] sm:$0xff]  ;;  %v31_v9 = vld [vmem:[#allocation2 + $0x28] sm:$0xff]  ;;  %v116_v12 = vld [vmem:[#allocation2 + $0x90] sm:$0xff]  ;;  %s955_s26 = smov 6   ;;  %s956_s27 = smov 4   ;;  %vm506_vm2 = vcmask 39936  }
  0x15   :  { %v114_v10 = vld [vmem:[#allocation2 + $0x80] sm:$0xff]  ;;  %v115_v11 = vld [vmem:[#allocation2 + $0x88] sm:$0xff]  ;;  %v117_v13 = vld [vmem:[#allocation2 + $0x98] sm:$0xff]  ;;  %v788_v14 = vpack.c.bf16 %v31_v9, %v30_v8  ;;  %vm508_vm3 = vcmask 48128   ;;  %vm510_vm4 = vcmask 56320   ;;  %vm512_vm5 = vcmask 64512  }
  0x16   :  { %783 = vmatpush3.bf16.msra.mxu0 %v782_v5  ;;  %v806_v15 = vpack.c.bf16 %v115_v11, %v114_v10  ;;  %v32_v16 = vld [vmem:[#allocation2 + $0x30] sm:$0xff]  ;;  %v33_v17 = vld [vmem:[#allocation2 + $0x38] sm:$0xff]  ;;  %v809_v18 = vpack.c.bf16 %v117_v13, %v116_v12  ;;  %v118_v19 = vld [vmem:[#allocation2 + $0xa0] sm:$0xff] }
  0x17   :  { %784 = vmatprep.subr.bf16.mxu0 %v948_v0  ;;  %v119_v20 = vld [vmem:[#allocation2 + $0xa8] sm:$0xff]  ;;  %v791_v21 = vpack.c.bf16 %v33_v17, %v32_v16  ;;  %v34_v22 = vld [vmem:[#allocation2 + $0x40] sm:$0xff]  ;;  %v120_v25 = vld [vmem:[#allocation2 + $0xb0] sm:$0xff] }
  0x18   :  { %807 = vmatpush3.bf16.msra.mxu1 %v806_v15  ;;  %v35_v23 = vld [vmem:[#allocation2 + $0x48] sm:$0xff]  ;;  %v812_v24 = vpack.c.bf16 %v119_v20, %v118_v19  ;;  %v121_v26 = vld [vmem:[#allocation2 + $0xb8] sm:$0xff]  ;;  %v36_v28 = vld [vmem:[#allocation2 + $0x50] sm:$0xff] }
  0x19   :  { %808 = vmatprep.subr.bf16.mxu1 %v948_v0  ;;  %v794_v27 = vpack.c.bf16 %v35_v23, %v34_v22  ;;  %v37_v29 = vld [vmem:[#allocation2 + $0x58] sm:$0xff]  ;;  %v815_v30 = vpack.c.bf16 %v121_v26, %v120_v25  ;;  %v122_v31 = vld [vmem:[#allocation2 + $0xc0] sm:$0xff]  ;;  %v123_v32 = vld [vmem:[#allocation2 + $0xc8] sm:$0xff] }
  0x1a   :  { %786 = vmatpush3.bf16.msra.mxu0 %v785_v7  ;;  %v797_v33 = vpack.c.bf16 %v37_v29, %v36_v28  ;;  %v38_v34 = vld [vmem:[#allocation2 + $0x60] sm:$0xff]  ;;  %v39_v35 = vld [vmem:[#allocation2 + $0x68] sm:$0xff]  ;;  %v818_v36 = vpack.c.bf16 %v123_v32, %v122_v31  ;;  %v124_v37 = vld [vmem:[#allocation2 + $0xd0] sm:$0xff] }
  0x1b   :  { %787 = vmatprep.subr.bf16.mxu0 %v948_v0  ;;  %v125_v38 = vld [vmem:[#allocation2 + $0xd8] sm:$0xff]  ;;  %v800_v39 = vpack.c.bf16 %v39_v35, %v38_v34  ;;  %v40_v40 = vld [vmem:[#allocation2 + $0x70] sm:$0xff]  ;;  %v126_v43 = vld [vmem:[#allocation2 + $0xe0] sm:$0xff] }
  0x1c   :  { %810 = vmatpush3.bf16.msra.mxu1 %v809_v18  ;;  %v41_v41 = vld [vmem:[#allocation2 + $0x78] sm:$0xff]  ;;  %v821_v42 = vpack.c.bf16 %v125_v38, %v124_v37  ;;  %v127_v44 = vld [vmem:[#allocation2 + $0xe8] sm:$0xff]  ;;  %v1006_v47 = vld [vmem:[%s1046_s0] sm:$0xff]  ;;  %s951_s0 = smov 3  }
  0x1d   :  { %811 = vmatprep.subr.bf16.mxu1 %v948_v0  ;;  %v803_v45 = vpack.c.bf16 %v41_v41, %v40_v40  ;;  %v824_v46 = vpack.c.bf16 %v127_v44, %v126_v43  ;;  %v128_v48 = vld [vmem:[#allocation2 + $0xf0] sm:$0xff]  ;;  %v129_v49 = vld [vmem:[#allocation2 + $0xf8] sm:$0xff]  ;;  %v202_v51 = vld [vmem:[#allocation2 + $0x100] sm:$0xff] }
  0x1e   :  { %789 = vmatpush3.bf16.msra.mxu0 %v788_v14  ;;  %v827_v50 = vpack.c.bf16 %v129_v49, %v128_v48  ;;  %v203_v52 = vld [vmem:[#allocation2 + $0x108] sm:$0xff]  ;;  %v204_v53 = vld [vmem:[#allocation2 + $0x110] sm:$0xff]  ;;  %v205_v55 = vld [vmem:[#allocation2 + $0x118] sm:$0xff] }
  0x1f   :  { %790 = vmatprep.subr.bf16.mxu0 %v948_v0  ;;  %v830_v54 = vpack.c.bf16 %v203_v52, %v202_v51  ;;  %v833_v56 = vpack.c.bf16 %v205_v55, %v204_v53  ;;  %v206_v57 = vld [vmem:[#allocation2 + $0x120] sm:$0xff]  ;;  %v207_v58 = vld [vmem:[#allocation2 + $0x128] sm:$0xff]  ;;  %v208_v60 = vld [vmem:[#allocation2 + $0x130] sm:$0xff] }
  0x20   :  { %813 = vmatpush3.bf16.msra.mxu1 %v812_v24  ;;  %v836_v59 = vpack.c.bf16 %v207_v58, %v206_v57  ;;  %v209_v61 = vld [vmem:[#allocation2 + $0x138] sm:$0xff]  ;;  %v210_v63 = vld [vmem:[#allocation2 + $0x140] sm:$0xff]  ;;  %v211_v2 = vld [vmem:[#allocation2 + $0x148] sm:$0xff] }
  0x21   :  { %814 = vmatprep.subr.bf16.mxu1 %v948_v0  ;;  %v839_v62 = vpack.c.bf16 %v209_v61, %v208_v60  ;;  %v842_v3 = vpack.c.bf16 %v211_v2, %v210_v63  ;;  %v42_v4 = vld [vmem:[#allocation2 + $0x288] sm:$0xff]  ;;  %v212_v9 = vld [vmem:[#allocation2 + $0x150] sm:$0xff]  ;;  %v213_v10 = vld [vmem:[#allocation2 + $0x158] sm:$0xff] }
  0x22   :  { %792 = vmatpush3.bf16.msra.mxu0 %v791_v21  ;;  %v845_v11 = vpack.c.bf16 %v213_v10, %v212_v9  ;;  %v214_v12 = vld [vmem:[#allocation2 + $0x160] sm:$0xff]  ;;  %v215_v13 = vld [vmem:[#allocation2 + $0x168] sm:$0xff]  ;;  %v216_v15 = vld [vmem:[#allocation2 + $0x170] sm:$0xff] }
  0x23   :  { %793 = vmatprep.subr.bf16.mxu0 %v948_v0  ;;  %v848_v14 = vpack.c.bf16 %v215_v13, %v214_v12  ;;  %v217_v16 = vld [vmem:[#allocation2 + $0x178] sm:$0xff]  ;;  %v130_v18 = vld [vmem:[#allocation2 + $0x290] sm:$0xff]  ;;  %v316_v32 = vld [vmem:[#allocation2 + $0x188] sm:$0xff] }
  0x24   :  { %816 = vmatpush3.bf16.msra.mxu1 %v815_v30  ;;  %v851_v17 = vpack.c.bf16 %v217_v16, %v216_v15  ;;  %v218_v23 = vld [vmem:[#allocation2 + $0x298] sm:$0xff]  ;;  %v952_v30 = vmov 0   ;;  %v320_v38 = vld [vmem:[#allocation2 + $0x1a8] sm:$0xff]  ;;  %v327_v48 = vld [vmem:[#allocation2 + $0x1e0] sm:$0xff] }
  0x25   :  { %817 = vmatprep.subr.bf16.mxu1 %v948_v0  ;;  %913 = vset.pattern.permute.xlu1 %v952_v30  ;;  %v318_v34 = vld [vmem:[#allocation2 + $0x198] sm:$0xff]  ;;  %v324_v44 = vld [vmem:[#allocation2 + $0x1c8] sm:$0xff]  ;;  %v329_v51 = vld [vmem:[#allocation2 + $0x1f0] sm:$0xff] }
  0x26   :  { %795 = vmatpush3.bf16.msra.mxu0 %v794_v27  ;;  %914 = vset.pattern.permute.xlu0 %v952_v30  ;;  %v322_v41 = vld [vmem:[#allocation2 + $0x1b8] sm:$0xff]  ;;  %v404_v58 = vld [vmem:[#allocation2 + $0x208] sm:$0xff]  ;;  %v413_v9 = vld [vmem:[#allocation2 + $0x250] sm:$0xff] }
  0x27   :  { %796 = vmatprep.subr.bf16.mxu0 %v948_v0  ;;  %v330_v55 = vld [vmem:[#allocation2 + $0x1f8] sm:$0xff]  ;;  %v408_v2 = vld [vmem:[#allocation2 + $0x228] sm:$0xff]  ;;  %v302_v12 = vld [vmem:[#allocation2 + $0x2a0] sm:$0xff] }
  0x28   :  { %819 = vmatpush3.bf16.msra.mxu1 %v818_v36  ;;  %v319_v36 = vld [vmem:[#allocation2 + $0x1a0] sm:$0xff]  ;;  %v406_v60 = vld [vmem:[#allocation2 + $0x218] sm:$0xff] }
  0x29   :  { %820 = vmatprep.subr.bf16.mxu1 %v948_v0  ;;  %v857_v37 = vpack.c.bf16 %v319_v36, %v318_v34 }
  0x2a   :  { %798 = vmatpush3.bf16.msra.mxu0 %v797_v33  ;;  %v317_v33 = vld [vmem:[#allocation2 + $0x190] sm:$0xff] }
  0x2b   :  { %799 = vmatprep.subr.bf16.mxu0 %v948_v0 }
  0x2c   :  { %822 = vmatpush3.bf16.msra.mxu1 %v821_v42  ;;  %v323_v42 = vld [vmem:[#allocation2 + $0x1c0] sm:$0xff] }
  0x2d   :  { %823 = vmatprep.subr.bf16.mxu1 %v948_v0  ;;  %v863_v43 = vpack.c.bf16 %v323_v42, %v322_v41 }
  0x2e   :  { %801 = vmatpush3.bf16.msra.mxu0 %v800_v39  ;;  %v321_v39 = vld [vmem:[#allocation2 + $0x1b0] sm:$0xff] }
  0x2f   :  { %802 = vmatprep.subr.bf16.mxu0 %v948_v0  ;;  %v860_v40 = vpack.c.bf16 %v321_v39, %v320_v38 }
  0x30   :  { %825 = vmatpush3.bf16.msra.mxu1 %v824_v46 }
  0x31   :  { %826 = vmatprep.subr.bf16.mxu1 %v948_v0 }
  0x32   :  { %804 = vmatpush3.bf16.msra.mxu0 %v803_v45  ;;  %v325_v45 = vld [vmem:[#allocation2 + $0x1d0] sm:$0xff] }
  0x33   :  { %829 = vmatprep.subr.bf16.mxu0 %v948_v0  ;;  %v866_v46 = vpack.c.bf16 %v325_v45, %v324_v44 }
  0x34   :  { %828 = vmatpush3.bf16.msra.mxu1 %v827_v50  ;;  %v328_v50 = vld [vmem:[#allocation2 + $0x1e8] sm:$0xff] }
  0x35   :  { %639 = vmatmul.mubr.f32.vlgmr.msra.gmra.mrb[0].mxu0 %v1006_v47  ;;  %853 = vmatprep.subr.bf16.mxu1 %v948_v0  ;;  %v872_v52 = vpack.c.bf16 %v329_v51, %v328_v50 }
  0x36   :  { %708 = vmatprep.mubr.msk.f32.mxu0 %vm949_vm0, %v950_v1  ;;  %831 = vmatpush3.bf16.msra.mxu0 %v830_v54 }
  0x37   :  { %832 = vmatprep.subr.bf16.mxu0 %v948_v0 }
  0x3a   :  { %834 = vmatpush3.bf16.msra.mxu0 %v833_v56  ;;  %v331_v56 = vld [vmem:[#allocation2 + $0x200] sm:$0xff] }
  0x3b   :  { %835 = vmatprep.subr.bf16.mxu0 %v948_v0  ;;  %v875_v57 = vpack.c.bf16 %v331_v56, %v330_v55 }
  0x3e   :  { %837 = vmatpush3.bf16.msra.mxu0 %v836_v59  ;;  %v405_v59 = vld [vmem:[#allocation2 + $0x210] sm:$0xff] }
  0x3f   :  { %838 = vmatprep.subr.bf16.mxu0 %v948_v0  ;;  %v878_v61 = vpack.c.bf16 %v405_v59, %v404_v58 }
  0x42   :  { %840 = vmatpush3.bf16.msra.mxu0 %v839_v62  ;;  %v407_v62 = vld [vmem:[#allocation2 + $0x220] sm:$0xff] }
  0x43   :  { %841 = vmatprep.subr.bf16.mxu0 %v948_v0  ;;  %v881_v63 = vpack.c.bf16 %v407_v62, %v406_v60 }
  0x46   :  { %843 = vmatpush3.bf16.msra.mxu0 %v842_v3  ;;  %v409_v3 = vld [vmem:[#allocation2 + $0x230] sm:$0xff] }
  0x47   :  { %844 = vmatprep.subr.bf16.mxu0 %v948_v0 }
  0x4a   :  { %846 = vmatpush3.bf16.msra.mxu0 %v845_v11  ;;  %v520_v11 = vld [vmem:[#allocation2 + $0x180] ss:$0 sm:$0xff] }
  0x4b   :  { %847 = vmatprep.subr.bf16.mxu0 %v948_v0 }
  0x4e   :  { %849 = vmatpush3.bf16.msra.mxu0 %v848_v14 }
  0x4f   :  { %850 = vmatprep.subr.bf16.mxu0 %v948_v0 }
  0x52   :  { %852 = vmatpush3.bf16.msra.mxu0 %v851_v17  ;;  %v414_v17 = vld [vmem:[#allocation2 + $0x258] sm:$0xff] }
  0x53   :  { %877 = vmatprep.subr.bf16.mxu0 %v948_v0 }
 0x108   :  { %v109_v5 = vpop.f32.mrb[0].mxu0 }
 0x109   :  { %v110_v6 = vadd.f32 %v109_v5, %v42_v4  ;;  %v640_v7 = vpop.f32.mrb[1].mxu0  ;;  %v884_v4 = vpack.c.bf16 %v409_v3, %v408_v2  ;;  %v410_v5 = vld [vmem:[#allocation2 + $0x238] sm:$0xff] }
 0x10b   :  { %v113_v8 = vmax.f32 %v110_v6, 0.0  ;;  %v411_v6 = vld [vmem:[#allocation2 + $0x240] sm:$0xff] }
 0x10c   :  { %v887_v7 = vpack.c.bf16 %v411_v6, %v410_v5 }
 0x10d   :  { %674 = vmatmul.mubr.f32.vlgmr.msra.gmra.mrb[0].mxu1 %v113_v8  ;;  %v412_v8 = vld [vmem:[#allocation2 + $0x248] sm:$0xff] }
 0x10e   :  { %743 = vmatprep.mubr.msk.f32.mxu1 %vm949_vm0, %v950_v1  ;;  %v890_v10 = vpack.c.bf16 %v413_v9, %v412_v8 }
 0x1e0   :  { %v197_v19 = vpop.f32.mrb[0].mxu1 }
 0x1e1   :  { %v198_v20 = vadd.f32 %v197_v19, %v130_v18  ;;  %v675_v21 = vpop.f32.mrb[1].mxu1  ;;  %v415_v18 = vld [vmem:[#allocation2 + $0x260] sm:$0xff] }
 0x1e2   :  { %v893_v19 = vpack.c.bf16 %v415_v18, %v414_v17  ;;  %v417_v21 = vld [vmem:[#allocation2 + $0x270] sm:$0xff] }
 0x1e3   :  { %915 = vtanh.f32 %v198_v20  ;;  %v416_v20 = vld [vmem:[#allocation2 + $0x268] sm:$0xff] }
 0x1ed   :  { %v916_v22 = vpop.eup %915 }
 0x1ee   :  { %709 = vmatmul.mubr.f32.vlgmr.msra.gmra.mrb[2].mxu0 %v916_v22  ;;  %v896_v22 = vpack.c.bf16 %v417_v21, %v416_v20 }
 0x1ef   :  { %778 = vmatprep.mubr.msk.f32.mxu0 %vm949_vm0, %v950_v1  ;;  %v854_v1 = vpack.c.bf16 %v317_v33, %v316_v32  ;;  %879 = vmatpush3.bf16.msra.mxu0 %v878_v61  ;;  %v420_v32 = vld [vmem:[#allocation2 + $0x2b0] sm:$0xff] }
 0x1f0   :  { %880 = vmatprep.subr.bf16.mxu0 %v948_v0 }
 0x1f1   :  { %855 = vmatpush3.bf16.msra.mxu1 %v854_v1 }
 0x1f2   :  { %856 = vmatprep.subr.bf16.mxu1 %v948_v0 }
 0x1f3   :  { %882 = vmatpush3.bf16.msra.mxu0 %v881_v63 }
 0x1f4   :  { %883 = vmatprep.subr.bf16.mxu0 %v948_v0 }
 0x1f5   :  { %858 = vmatpush3.bf16.msra.mxu1 %v857_v37 }
 0x1f6   :  { %859 = vmatprep.subr.bf16.mxu1 %v948_v0 }
 0x1f7   :  { %885 = vmatpush3.bf16.msra.mxu0 %v884_v4 }
 0x1f8   :  { %886 = vmatprep.subr.bf16.mxu0 %v948_v0 }
 0x1f9   :  { %861 = vmatpush3.bf16.msra.mxu1 %v860_v40 }
 0x1fa   :  { %862 = vmatprep.subr.bf16.mxu1 %v948_v0 }
 0x1fb   :  { %888 = vmatpush3.bf16.msra.mxu0 %v887_v7 }
 0x1fc   :  { %889 = vmatprep.subr.bf16.mxu0 %v948_v0 }
 0x1fd   :  { %864 = vmatpush3.bf16.msra.mxu1 %v863_v43 }
 0x1fe   :  { %865 = vmatprep.subr.bf16.mxu1 %v948_v0 }
 0x1ff   :  { %891 = vmatpush3.bf16.msra.mxu0 %v890_v10 }
 0x200   :  { %892 = vmatprep.subr.bf16.mxu0 %v948_v0 }
 0x201   :  { %867 = vmatpush3.bf16.msra.mxu1 %v866_v46 }
 0x202   :  { %868 = vmatprep.subr.bf16.mxu1 %v948_v0 }
 0x203   :  { %894 = vmatpush3.bf16.msra.mxu0 %v893_v19 }
 0x204   :  { %895 = vmatprep.subr.bf16.mxu0 %v948_v0 }
 0x207   :  { %897 = vmatpush3.bf16.msra.mxu0 %v896_v22 }
 0x208   :  { %898 = vmatprep.subr.bf16.mxu0 %v948_v0 }
 0x2c1   :  { %v285_v24 = vpop.f32.mrb[2].mxu0 }
 0x2c2   :  { %v286_v25 = vadd.f32 %v285_v24, %v218_v23  ;;  %v710_v26 = vpop.f32.mrb[3].mxu0  ;;  %v418_v23 = vld [vmem:[#allocation2 + $0x278] sm:$0xff]  ;;  %v419_v24 = vld [vmem:[#allocation2 + $0x280] sm:$0xff] }
 0x2c3   :  { %v332_v26 = vld [vmem:[#allocation2 + $0x2a8] sm:$0xff] }
 0x2c4   :  { %v289_v27 = vmul.f32 0.5, %v286_v25 }
 0x2c6   :  { %v290_v28 = vmul.f32 1.442695, %v289_v27 }
 0x2c8   :  { %917 = vpow2.f32 %v290_v28 }
 0x2d2   :  { %v918_v29 = vpop.eup %917 }
 0x2d3   :  { %293 = vrot.lane.b32.xlu0 %v918_v29, %s951_s0 }
 0x345   :  { %v294_v31 = vpop.permute.xlu0 %293 }
 0x346   :  { %v296_v35 = vmul.f32 %v294_v31, %v1006_v47  ;;  %v326_v47 = vld [vmem:[#allocation2 + $0x1d8] sm:$0xff] }
 0x347   :  { %v869_v49 = vpack.c.bf16 %v327_v48, %v326_v47 }
 0x348   :  { %298 = vrot.lane.b32.xlu0 %v296_v35, %s953_s24 }
 0x349   :  { %870 = vmatpush3.bf16.msra.mxu1 %v869_v49 }
 0x34a   :  { %871 = vmatprep.subr.bf16.mxu1 %v948_v0 }
 0x34c   :  { %495 = vrot.lane.b32.xlu0 %v286_v25, %s954_s25 }
 0x34d   :  { %873 = vmatpush3.bf16.msra.mxu1 %v872_v52 }
 0x34e   :  { %874 = vmatprep.subr.bf16.mxu1 %v948_v0 }
 0x350   :  { %501 = vrot.lane.b32.xlu0 %v286_v25, %s955_s26 }
 0x351   :  { %876 = vmatpush3.bf16.msra.mxu1 %v875_v57 }
 0x3ba   :  { %v299_v53 = vpop.permute.xlu0 %298 }
 0x3bb   :  { %v301_v54 = vadd.f32 %v299_v53, %v286_v25  ;;  %v899_v25 = vpack.c.bf16 %v419_v24, %v418_v23 }
 0x3bd   :  { %306 = vperm.xlu1 %913, %v301_v54   ;;  %900 = vmatpush3.bf16.msra.mxu0 %v899_v25 }
 0x3be   :  { %v496_v33 = vpop.permute.xlu0 %495 }
 0x3c1   :  { %491 = vrot.lane.b32.xlu1 %v301_v54, %s956_s27 }
 0x3c2   :  { %v502_v38 = vpop.permute.xlu0 %501 }
 0x3c5   :  { %498 = vrot.lane.b32.xlu1 %v918_v29, %s954_s25 }
 0x43c   :  { %v307_v13 = vpop.permute.xlu1 %306 }
 0x43d   :  { %v313_v14 = vmul.f32 %v520_v11, %v307_v13 }
 0x43f   :  { %v314_v15 = vadd.f32 %v313_v14, %v302_v12 }
 0x440   :  { %v492_v31 = vpop.permute.xlu1 %491 }
 0x441   :  { %v315_v16 = vmax.f32 %v314_v15, 0.0 }
 0x443   :  { %744 = vmatmul.mubr.f32.vlgmr.msra.gmra.mrb[2].mxu1 %v315_v16 }
 0x444   :  { %v499_v0 = vpop.permute.xlu1 %498 }
 0x516   :  { %v399_v27 = vpop.f32.mrb[2].mxu1 }
 0x517   :  { %v400_v28 = vadd.f32 %v399_v27, %v332_v26  ;;  %v745_v29 = vpop.f32.mrb[3].mxu1 }
 0x519   :  { %919 = vtanh.f32 %v400_v28 }
 0x523   :  { %v920_v30 = vpop.eup %919 }
 0x524   :  { %779 = vmatmul.mubr.f32.vlgmr.msra.gmra.mrb[4].mxu0 %v920_v30 }
 0x5f7   :  { %v487_v34 = vpop.f32.mrb[4].mxu0 }
 0x5f8   :  { %v488_v35 = vadd.f32 %v487_v34, %v420_v32  ;;  %v780_v1 = vpop.f32.mrb[5].mxu0 }
 0x5fa   :  { %v505_v36 = vsel %vm504_vm1, %v488_v35, %v492_v31 }
 0x5fb   :  { %v507_v37 = vsel %vm506_vm2, %v505_v36, %v496_v33 }
 0x5fc   :  { %v509_v39 = vsel %vm508_vm3, %v507_v37, %v499_v0 }
 0x5fd   :  { %v511_v40 = vsel %vm510_vm4, %v509_v39, %v502_v38 }
 0x5fe   :  { %v513_v41 = vsel %vm512_vm5, %v511_v40, 0.0 }
 0x5ff   :  { %514 = vst [vmem:[%s1048_s2] sm:$0xff] %v513_v41 }
 0x600   :  { %519 = vsyncpa [#allocation3], 1 }

</bundles_post_ra>
